<compile_context>
chip_gen: v6e
topology: v6e:2x2x1
jax: 0.10.0
libtpu: 0.0.40
codegen_flags: <defaults>
</compile_context>

<pallas_src>
import functools

import jax
import jax.numpy as jnp
from jax import lax
from jax.experimental import pallas as pl
from jax.experimental.pallas import tpu as pltpu


def _se_kernel(x_ref, w1_ref, w2_ref, o_ref, *, inv_hw, chunk, num_chunks):
    """Per-batch SE body.

    x_ref : (C, HW_pad)   input slab for one batch element (VMEM)
    w1_ref: (C_red, C)    first Linear weight, PyTorch (out, in) layout
    w2_ref: (C, C_red)    second Linear weight, PyTorch (out, in) layout
    o_ref : (C, HW_pad)   output slab
    """
    C = x_ref.shape[0]
    unroll = num_chunks <= 16

    # ---- Pass 1: squeeze (global average pool), streamed over HW chunks. ----
    def reduce_body(i, acc):
        start = pl.multiple_of(i * chunk, 128)
        xc = x_ref[:, pl.ds(start, chunk)].astype(jnp.float32)   # (C, chunk)
        return acc + jnp.sum(xc, axis=-1, keepdims=True)         # (C, 1)

    ssum = lax.fori_loop(0, num_chunks, reduce_body,
                         jnp.zeros((C, 1), jnp.float32), unroll=unroll)
    y = ssum * inv_hw                                            # (C, 1) mean

    # ---- Excitation: relu(W1 @ y), sigmoid(W2 @ h). Column form equals the
    # PyTorch row form (y @ W1^T)^T, so the weights are used as-is (no .T). ----
    h = jnp.dot(w1_ref[...].astype(jnp.float32), y,
                preferred_element_type=jnp.float32)              # (C_red, 1)
    h = jnp.maximum(h, 0.0)
    s = jnp.dot(w2_ref[...].astype(jnp.float32), h,
                preferred_element_type=jnp.float32)              # (C, 1)
    gate = jax.nn.sigmoid(s)                                     # (C, 1)

    # ---- Pass 2: scale; re-stream x from VMEM (cheap vld) and write
    # lane-dense 128-multiple chunks. ----
    def scale_body(i, carry):
        start = pl.multiple_of(i * chunk, 128)
        xc = x_ref[:, pl.ds(start, chunk)].astype(jnp.float32)
        o_ref[:, pl.ds(start, chunk)] = (xc * gate).astype(o_ref.dtype)
        return carry

    lax.fori_loop(0, num_chunks, scale_body, 0, unroll=unroll)


def _pick_chunk(hw_pad, max_chunk=512):
    """Largest multiple of 128 that divides hw_pad and is <= max_chunk."""
    best = 128
    c = 128
    limit = min(hw_pad, max_chunk)
    while c <= limit:
        if hw_pad % c == 0:
            best = c
        c += 128
    return best


def se_layer(x, w1, w2):
    """x: (B, C, H, W); w1: (C//r, C); w2: (C, C//r). Returns (B, C, H, W)."""
    B, C, H, W = x.shape
    HW = H * W
    C_red = w1.shape[0]

    # Lane-dense spatial layout: pad HW up to a multiple of 128.
    HW_pad = ((HW + 127) // 128) * 128
    x_flat = x.reshape(B, C, HW)
    if HW_pad != HW:
        x_flat = jnp.pad(x_flat, ((0, 0), (0, 0), (0, HW_pad - HW)))

    chunk = _pick_chunk(HW_pad)
    num_chunks = HW_pad // chunk

    kernel = functools.partial(
        _se_kernel, inv_hw=1.0 / HW, chunk=chunk, num_chunks=num_chunks)

    # VMEM budget: in + out per-batch tiles (double-buffered) + weights + slack.
    itemsize = jnp.dtype(x.dtype).itemsize
    tile_bytes = C * HW_pad * itemsize
    w_bytes = (w1.size * jnp.dtype(w1.dtype).itemsize
               + w2.size * jnp.dtype(w2.dtype).itemsize)
    vmem_need = 4 * tile_bytes + 2 * w_bytes + (2 << 20)
    vmem_limit = int(min(max(vmem_need, 16 << 20), 64 << 20))
    # TODO(synk): for very large H*W where a per-batch (C, HW) slab no longer
    # fits VMEM, split into a pooling kernel + a gate-and-scale kernel.

    cost = pl.CostEstimate(
        flops=int(B * (3 * C * HW + 4 * C * C_red)),
        transcendentals=int(B * C),
        bytes_accessed=int(2 * B * C * HW_pad * itemsize + B * w_bytes),
    )

    out_flat = pl.pallas_call(
        kernel,
        out_shape=jax.ShapeDtypeStruct((B, C, HW_pad), x.dtype),
        grid=(B,),
        in_specs=[
            pl.BlockSpec((None, C, HW_pad), lambda b: (b, 0, 0)),
            pl.BlockSpec((C_red, C), lambda b: (0, 0)),
            pl.BlockSpec((C, C_red), lambda b: (0, 0)),
        ],
        out_specs=pl.BlockSpec((None, C, HW_pad), lambda b: (b, 0, 0)),
        compiler_params=pltpu.CompilerParams(
            dimension_semantics=("parallel",),
            vmem_limit_bytes=vmem_limit,
        ),
        cost_estimate=cost,
    )(x_flat, w1, w2)

    if HW_pad != HW:
        out_flat = out_flat[:, :, :HW]
    return out_flat.reshape(B, C, H, W)


def se_layer_ref(x, w1, w2):
    """Pure-JAX reference matching the PyTorch forward."""
    y = jnp.mean(x.astype(jnp.float32), axis=(2, 3))        # (B, C)
    h = jnp.maximum(y @ w1.astype(jnp.float32).T, 0.0)      # (B, C//r)
    s = jax.nn.sigmoid(h @ w2.astype(jnp.float32).T)        # (B, C)
    return (x.astype(jnp.float32) * s[:, :, None, None]).astype(x.dtype)


if __name__ == "__main__":
    reduction = 16

    # Case 1: HW already a multiple of 128 (lane-dense, no padding path).
    B, C, H, W = 2, 64, 16, 16
    C_red = C // reduction  # 4

    key = jax.random.PRNGKey(0)
    kx, k1, k2, kx2 = jax.random.split(key, 4)

    x = jax.random.normal(kx, (B, C, H, W), dtype=jnp.float32)
    # PyTorch Linear weight shape is (out_features, in_features).
    w1 = jax.random.normal(k1, (C_red, C), dtype=jnp.float32) * 0.1
    w2 = jax.random.normal(k2, (C, C_red), dtype=jnp.float32) * 0.1

    out = jax.block_until_ready(se_layer(x, w1, w2))
    ref = jax.block_until_ready(se_layer_ref(x, w1, w2))
    assert out.shape == (B, C, H, W)
    assert jnp.allclose(out, ref, atol=1e-5, rtol=1e-5), "mismatch (case 1)"

    # Case 2: HW not a multiple of 128 (exercises the zero-pad / slice path).
    H2, W2 = 9, 7
    x2 = jax.random.normal(kx2, (B, C, H2, W2), dtype=jnp.float32)
    out2 = jax.block_until_ready(se_layer(x2, w1, w2))
    ref2 = jax.block_until_ready(se_layer_ref(x2, w1, w2))
    assert out2.shape == (B, C, H2, W2)
    assert jnp.allclose(out2, ref2, atol=1e-5, rtol=1e-5), "mismatch (case 2)"

    print("KERNEL_OK")
</pallas_src>

<mosaic_0001>
module attributes {stable_mosaic.version = 11 : i64} {
  func.func @_se_kernel(%arg0: i32, %arg1: memref<1x64x256xf32, #tpu.memory_space<vmem>>, %arg2: memref<4x64xf32, #tpu.memory_space<vmem>>, %arg3: memref<64x4xf32, #tpu.memory_space<vmem>>, %arg4: memref<1x64x256xf32, #tpu.memory_space<vmem>>) attributes {dimension_semantics = [#tpu.dimension_semantics<parallel>], iteration_bounds = array<i64: 2>, scalar_prefetch = 0 : i64, scratch_operands = 0 : i64, tpu.core_type = #tpu.core_type<tc>, window_params = [{transform_indices = @transform_0, window_bounds = array<i64: 1, 64, 256>}, {pipeline_mode = #tpu.pipeline_mode<synchronous>, transform_indices = @transform_1, window_bounds = array<i64: 4, 64>}, {pipeline_mode = #tpu.pipeline_mode<synchronous>, transform_indices = @transform_2, window_bounds = array<i64: 64, 4>}, {transform_indices = @transform_3, window_bounds = array<i64: 1, 64, 256>}]} {
    %cst = arith.constant 0.000000e+00 : f32
    %0 = vector.broadcast %cst : f32 to vector<64x1xf32>
    %c0_i32 = arith.constant 0 : i32
    %c256_i32 = arith.constant 256 : i32
    %1 = arith.muli %c0_i32, %c256_i32 : i32
    %2 = tpu.assume_multiple %1, 128 : i32
    %c0 = arith.constant 0 : index
    %c0_0 = arith.constant 0 : index
    %3 = arith.index_cast %2 : i32 to index
    %4 = vector.load %arg1[%c0, %c0_0, %3] : memref<1x64x256xf32, #tpu.memory_space<vmem>>, vector<1x64x256xf32>
    %5 = vector.shape_cast %4 : vector<1x64x256xf32> to vector<64x256xf32>
    %cst_1 = arith.constant dense<0.000000e+00> : vector<64xf32>
    %6 = vector.multi_reduction <add>, %5, %cst_1 [1] : vector<64x256xf32> to vector<64xf32>
    %7 = vector.shape_cast %6 : vector<64xf32> to vector<64x1xf32>
    %8 = arith.addf %0, %7 : vector<64x1xf32>
    %c1_i32 = arith.constant 1 : i32
    %cst_2 = arith.constant 3.906250e-03 : f32
    %9 = vector.broadcast %cst_2 : f32 to vector<64x1xf32>
    %10 = arith.mulf %8, %9 : vector<64x1xf32>
    %c0_3 = arith.constant 0 : index
    %c0_4 = arith.constant 0 : index
    %11 = vector.load %arg2[%c0_3, %c0_4] : memref<4x64xf32, #tpu.memory_space<vmem>>, vector<4x64xf32>
    %cst_5 = arith.constant dense<0.000000e+00> : vector<4x1xf32>
    %12 = tpu.matmul %11, %10, %cst_5 {dimension_numbers = #tpu.dot_dimension_numbers<[1], [0], [0], [1], [0, 0, 1, 1], [], []>} : vector<4x64xf32>, vector<64x1xf32>, vector<4x1xf32> -> vector<4x1xf32>
    %cst_6 = arith.constant 0.000000e+00 : f32
    %13 = vector.broadcast %cst_6 : f32 to vector<4x1xf32>
    %14 = arith.maximumf %12, %13 : vector<4x1xf32>
    %c0_7 = arith.constant 0 : index
    %c0_8 = arith.constant 0 : index
    %15 = vector.load %arg3[%c0_7, %c0_8] : memref<64x4xf32, #tpu.memory_space<vmem>>, vector<64x4xf32>
    %cst_9 = arith.constant dense<0.000000e+00> : vector<64x1xf32>
    %16 = tpu.matmul %15, %14, %cst_9 {dimension_numbers = #tpu.dot_dimension_numbers<[1], [0], [0], [1], [0, 0, 1, 1], [], []>} : vector<64x4xf32>, vector<4x1xf32>, vector<64x1xf32> -> vector<64x1xf32>
    %17 = arith.negf %16 : vector<64x1xf32>
    %18 = math.exp %17 : vector<64x1xf32>
    %cst_10 = arith.constant 1.000000e+00 : f32
    %19 = vector.broadcast %cst_10 : f32 to vector<64x1xf32>
    %20 = arith.addf %19, %18 : vector<64x1xf32>
    %21 = arith.divf %19, %20 : vector<64x1xf32>
    %c0_i32_11 = arith.constant 0 : i32
    %c256_i32_12 = arith.constant 256 : i32
    %22 = arith.muli %c0_i32_11, %c256_i32_12 : i32
    %23 = tpu.assume_multiple %22, 128 : i32
    %c0_13 = arith.constant 0 : index
    %c0_14 = arith.constant 0 : index
    %24 = arith.index_cast %23 : i32 to index
    %25 = vector.load %arg1[%c0_13, %c0_14, %24] : memref<1x64x256xf32, #tpu.memory_space<vmem>>, vector<1x64x256xf32>
    %26 = vector.shape_cast %25 : vector<1x64x256xf32> to vector<64x256xf32>
    %27 = vector.broadcast %21 : vector<64x1xf32> to vector<64x256xf32>
    %28 = arith.mulf %26, %27 : vector<64x256xf32>
    %c0_15 = arith.constant 0 : index
    %c0_16 = arith.constant 0 : index
    %29 = arith.index_cast %23 : i32 to index
    %30 = vector.load %arg4[%c0_15, %c0_16, %29] : memref<1x64x256xf32, #tpu.memory_space<vmem>>, vector<1x64x256xf32>
    %31 = vector.shape_cast %30 : vector<1x64x256xf32> to vector<64x256xf32>
    %32 = vector.shape_cast %28 : vector<64x256xf32> to vector<1x64x256xf32>
    tpu.vector_store %arg4[%c0_15, %c0_16, %29], %32 {strides = array<i32>} : memref<1x64x256xf32, #tpu.memory_space<vmem>>, vector<1x64x256xf32>,
    %c1_i32_17 = arith.constant 1 : i32
    return
  }
  func.func @transform_0(%arg0: i32) -> (i32, i32, i32) {
    %c0_i32 = arith.constant 0 : i32
    %c0_i32_0 = arith.constant 0 : i32
    %c0_i32_1 = arith.constant 0 : i32
    return %arg0, %c0_i32, %c0_i32_0 : i32, i32, i32
  }
  func.func @transform_1(%arg0: i32) -> (i32, i32) {
    %c0_i32 = arith.constant 0 : i32
    %c0_i32_0 = arith.constant 0 : i32
    %c0_i32_1 = arith.constant 0 : i32
    return %c0_i32, %c0_i32_0 : i32, i32
  }
  func.func @transform_2(%arg0: i32) -> (i32, i32) {
    %c0_i32 = arith.constant 0 : i32
    %c0_i32_0 = arith.constant 0 : i32
    %c0_i32_1 = arith.constant 0 : i32
    return %c0_i32, %c0_i32_0 : i32, i32
  }
  func.func @transform_3(%arg0: i32) -> (i32, i32, i32) {
    %c0_i32 = arith.constant 0 : i32
    %c0_i32_0 = arith.constant 0 : i32
    %c0_i32_1 = arith.constant 0 : i32
    return %arg0, %c0_i32, %c0_i32_0 : i32, i32, i32
  }
}

</mosaic_0001>

<bundles_post_ra>
// kernel: tpu_custom_call.1
= control target key start
LH: loop header
LB: loop body
LE: loop exit
PB: predicated region body
PF: predicated region fallthrough
CT: control target
= control target key end

     0   :  { %8 = vsyncpa [#allocation3], 0  ;;  %s1241_s0 = inlined_call_operand.hbm [shape: f32[2,64,256], index: 0, kind: input, shape index: {}]   ;;  %s1242_s1 = inlined_call_operand.vmem [shape: f32[4,64], index: 1, kind: input, shape index: {}]   ;;  %s1243_s2 = inlined_call_operand.vmem [shape: f32[64,4], index: 2, kind: input, shape index: {}]   ;;  %s1244_s3 = inlined_call_operand.hbm [shape: f32[2,64,256], index: 3, kind: output, shape index: {}]  }
   0x1   :  { %10 = vsyncpa [#allocation3 + $0x1], 0 }
   0x2   :  { %11 = vsyncpa [#allocation4], 0 }
   0x3   :  { %13 = vsyncpa [#allocation4 + $0x1], 0  ;;  %s965_s12 = smov 0   ;;  %s967_s13 = smov 0  }
   0x4   :  { %s969_s14 = smov 0   ;;  %s971_s15 = smov 0  }
   0x5 LB: > { %s986_s16 = sadd.s32 4294967295, %s934_s15   ;;  %s670_s17 = sadd.s32 4294967294, %s934_s15   ;;  %s934_s15 = sphi %s971_s15, %s1259_s15   ;;  %s930_s14 = sphi %s969_s14, %s1258_s14   ;;  %s926_s13 = sphi %s967_s13, %s1257_s13   ;;  %s922_s12 = sphi %s965_s12, %s1256_s12  }
   0x6   : > { %s990_s18 = sadd.s32 1, %s934_s15   ;;  %s26_s19 = sadd.s32 1, %s930_s14 }
   0x7   : > { %s23_s20 = ssub.s32 %s934_s15, %s990_s18  ;;  %p33_p0 = scmp.ne.s32.totalorder %s930_s14, %s926_s13 }
   0x8   : > { %p24_p1 = scmp.eq.s32.totalorder %s23_s20, 0  ;;  %p34_p2 = scmp.eq.s32.totalorder %s934_s15, 0 }
   0x9   : > { %p39_p3 = scmp.ne.s32.totalorder %s926_s13, %s922_s12  ;;  %p40_p4 = scmp.eq.s32.totalorder %s986_s16, 0 }
   0xa   : > { %s1002_s21 = scalar_select %p24_p1, %s930_s14, %s26_s19  }
   0xb   : > { %p1004_p5 = por %p34_p2, %p33_p0  ;;  %p1008_p6 = por %p40_p4, %p39_p3 }
   0xc   : > { %p105_p7 = scmp.eq.s32.totalorder %s986_s16, 1  ;;  %p111_p8 = scmp.eq.s32.totalorder %s670_s17, 1 }
   0xd   : > { %s1248_s23 = scalar_select %p1008_p6, 1, 0 }
   0xe   : > { %p767_p10 = scmp.lt.s32.totalorder %s934_s15, 2  ;;  %p1015_p11 = por %p105_p7, %p33_p0 }
   0xf   : > { %p1019_p12 = por %p111_p8, %p39_p3  ;;  %s137_s26 = sand.u32 1, %s930_s14  }
  0x10   : > { %s1249_s24 = scalar_select %p1015_p11, 1, 0 }
  0x11   : > { %s1250_s25 = scalar_select %p1019_p12, 1, 0 }
  0x12   : > { %s702_s27 = sshll.u32 %s934_s15, 11  ;;  %s673_s28 = sshll.u32 %s137_s26, 7 }
  0x13   : > { %s1028_s4 = scalar_lea.hbm %s1241_s0, %s702_s27  ;;  %s141_s5 = scalar_lea.vmem [#allocation2], %s673_s28 }
  0x14   : > { %s148_s6 = sshll.u32 %s141_s5, 4  ;;  %p1032_p13 = pnand %p767_p10, %p1004_p5  ;;  %s1036_s6 = int_to_ptr.vmem [resolvable:$true] %s148_s6 }
  0x15   : > { %s1038_s8 = scalar_lea.sflag [#allocation3], %s137_s26  ;;  %s842_s9 = scalar_lea.hbm %s1028_s4, 2048 }
  0x16   : > { %p843_p0 = scmp.ne.s32.totalorder %s1028_s4, %s842_s9  ;;  %p844_p1 = pneg %p1032_p13 }
  0x17   : > { %s847_s17 = scalar_lea.hbm %s1241_s0, 4096  ;;  %p848_p4 = scmp.lt.s32.totalorder %s1028_s4, %s1241_s0 }
  0x18   : > { %p845_p2 = pnand %p844_p1, %p843_p0  ;;  %p849_p5 = scmp.lt.s32.totalorder %s847_s17, %s842_s9 }
  0x1a   : > { %p846_p3 = pneg %p845_p2  ;;  %p850_p7 = por %p849_p5, %p848_p4 }
  0x1c   : > { %p851_p8 = pnand %p850_p7, %p846_p3 }
  0x1e   : > { %854 = shalt.err (!%p851_p8)
}
  0x1f   : > { %s855_s22 = scalar_lea.vmem %s1036_s6, 2048  ;;  %s936_s26 = smov [#allocation2]  }
  0x20   : > { %p856_p10 = scmp.ne.s32.totalorder %s1036_s6, %s855_s22  ;;  %s860_s27 = sshll.u32 %s936_s26, 4  ;;  %s861_s27 = int_to_ptr.vmem [resolvable:$false] %s860_s27 }
  0x21   : > { %s862_s28 = scalar_lea.vmem %s861_s27, 4096  ;;  %p863_p2 = scmp.lt.s32.totalorder %s1036_s6, %s861_s27 }
  0x22   : > { %p858_p9 = pnand %p856_p10, %p844_p1  ;;  %p864_p12 = scmp.lt.s32.totalorder %s862_s28, %s855_s22 }
  0x24   : > { %p859_p0 = pneg %p858_p9  ;;  %p865_p11 = por %p864_p12, %p863_p2 }
  0x26   : > { %p866_p6 = pnand %p865_p11, %p859_p0 }
  0x28   : > { %869 = shalt.err (!%p866_p6)
}
  0x29   : > { %s937_s29 = smov 256   ;;  %s938_s30 = smov 16  }
  0x2a   : > { %762 = dma.hbm_to_vmem [thread:$0]  (!%p1032_p13), %s1028_s4, 2048, %s1036_s6, %s1038_s8, %s937_s29, %s937_s29, %s938_s30  }
  0x2b   : > { %p676_p9 = scmp.ge.s32.totalorder %s934_s15, 1  ;;  %p156_p1 = scmp.lt.s32.totalorder %s934_s15, 3 }
  0x2d   : > { %p157_p3 = pnand %p676_p9, %p156_p1 }
  0x2e   : > { %s1062_s5 = sand.u32 (!%p157_p3), 1, %s926_s13   ;;  %p1252_p6 = scmp.ne.s32.totalorder (!%p157_p3), %s1248_s23, 0 }
  0x2f   : > { %160 = sbr.rel (%p157_p3) target bundleno = 799 (0x31f), region = 32  ;;  %s677_s9 = sshll.u32 (!%p157_p3), %s1062_s5, 7 }
  0x30   : > { %s163_s10 = scalar_lea.sflag (!%p157_p3), [#allocation3], %s1062_s5  ;;  %s166_s11 = scalar_lea.vmem (!%p157_p3), [#allocation2], %s677_s9 }
  0x34   : > { %913 = dma.done.wait (%p1252_p6), %s163_s10, 2048  }
  0x35   : > { %915 = vsyncadd (%p1252_p6), %s163_s10, 4294965248  ;;  %v1072_v0 = vld [vmem:[%s166_s11 + $0x70] sm:$0xff]  ;;  %v1074_v1 = vld [vmem:[%s166_s11 + $0x78] sm:$0xff]  ;;  %v939_v24 = vmov 0.0   ;;  %vm940_vm0 = vmmov 0   ;;  %vm246_vm1 = vcmask 523264  }
  0x36   : > { %v1076_v2 = vld [vmem:[%s166_s11 + $0x60] sm:$0xff]  ;;  %v226_v3 = vadd.f32 %v1074_v1, %v1072_v0  ;;  %v1080_v4 = vld [vmem:[%s166_s11 + $0x68] sm:$0xff]  ;;  %v1082_v5 = vld [vmem:[%s166_s11 + $0x50] sm:$0xff]  ;;  %722 = vmatprep.subr.mxu0 %v939_v24  ;;  %738 = vmatprep.mubr.msk.f32.mxu0 %vm940_vm0, %v939_v24  ;;  %vm329_vm2 = vcmask 31744   ;;  %vm354_vm3 = vcmask 1043456   ;;  %v941_v53 = vmov 0  }
  0x37   : > { %v1084_v6 = vld [vmem:[%s166_s11 + $0x58] sm:$0xff]  ;;  %v1088_v8 = vld [vmem:[%s166_s11 + $0x40] sm:$0xff]  ;;  %v1090_v9 = vld [vmem:[%s166_s11 + $0x48] sm:$0xff]  ;;  %v223_v10 = vadd.f32 %v1080_v4, %v1076_v2  ;;  %809 = vset.pattern.permute.xlu1 %v941_v53  ;;  %808 = vset.pattern.permute.xlu0 %v941_v53  ;;  %s1159_s6 = scalar_lea.vmem [#allocation5], %s677_s9  ;;  %s703_s9 = sshll.u32 %s986_s16, 11 }
  0x38   : > { %v220_v7 = vadd.f32 %v1084_v6, %v1082_v5  ;;  %227 = vadd.xlane.f32.xlu0 %v226_v3  ;;  %v217_v11 = vadd.f32 %v1090_v9, %v1088_v8  ;;  %v1096_v12 = vld [vmem:[%s166_s11 + $0x30] sm:$0xff]  ;;  %v1098_v13 = vld [vmem:[%s166_s11 + $0x38] sm:$0xff]  ;;  %v1100_v14 = vld [vmem:[%s166_s11 + $0x20] sm:$0xff]  ;;  %s597_s7 = sshll.u32 %s1159_s6, 4  ;;  %s1192_s19 = scalar_lea.hbm %s1244_s3, %s703_s9  ;;  %s1194_s7 = int_to_ptr.vmem [resolvable:$true] %s597_s7 }
  0x39   : > { %v1102_v15 = vld [vmem:[%s166_s11 + $0x28] sm:$0xff]  ;;  %v214_v16 = vadd.f32 %v1098_v13, %v1096_v12  ;;  %v1108_v18 = vld [vmem:[%s166_s11 + $0x10] sm:$0xff]  ;;  %v1110_v19 = vld [vmem:[%s166_s11 + $0x18] sm:$0xff]  ;;  %s584_s16 = scalar_lea.sflag [#allocation4], %s1062_s5  ;;  %s870_s20 = scalar_lea.vmem %s1194_s7, 2048 }
  0x3a   : > { %221 = vadd.xlane.f32.xlu1 %v220_v7  ;;  %v211_v17 = vadd.f32 %v1102_v15, %v1100_v14  ;;  %v1112_v20 = vld [vmem:[%s166_s11] sm:$0xff]  ;;  %v1114_v21 = vld [vmem:[%s166_s11 + $0x8] sm:$0xff]  ;;  %v208_v22 = vadd.f32 %v1110_v19, %v1108_v18  ;;  %v323_v47 = vld [vmem:[%s1243_s2 + $0x10] sm:$0xff]  ;;  %p871_p11 = scmp.ne.s32.totalorder %s1194_s7, %s870_s20  ;;  %p1253_p12 = scmp.ne.s32.totalorder %s1249_s24, 0 }
  0x3b   : > { %v205_v23 = vadd.f32 %v1114_v21, %v1112_v20  ;;  %v245_v41 = vld [vmem:[%s1242_s1] sm:$0xf]  ;;  %v322_v46 = vld [vmem:[%s1243_s2 + $0x8] sm:$0xff]  ;;  %v324_v48 = vld [vmem:[%s1243_s2 + $0x18] sm:$0xff]  ;;  %s942_s22 = smov [#allocation5]  }
  0x3c   : > { %224 = vadd.xlane.f32.xlu0 %v223_v10  ;;  %v321_v42 = vld [vmem:[%s1243_s2] sm:$0xff]  ;;  %v326_v50 = vld [vmem:[%s1243_s2 + $0x28] sm:$0xff]  ;;  %v327_v51 = vld [vmem:[%s1243_s2 + $0x30] sm:$0xff]  ;;  %p872_p13 = pnand %p871_p11, %p1253_p12  ;;  %s874_s26 = sshll.u32 %s942_s22, 4  ;;  %s875_s26 = int_to_ptr.vmem [resolvable:$false] %s874_s26 }
  0x3d   : > { %743 = vmatprep.mubr.msk.f32.mxu1 %vm329_vm2, %v321_v42  ;;  %v325_v49 = vld [vmem:[%s1243_s2 + $0x20] sm:$0xff]  ;;  %v328_v52 = vld [vmem:[%s1243_s2 + $0x38] sm:$0xff]  ;;  %s876_s27 = scalar_lea.vmem %s875_s26, 4096  ;;  %p877_p5 = scmp.lt.s32.totalorder %s1194_s7, %s875_s26 }
  0x3e   : > { %218 = vadd.xlane.f32.xlu1 %v217_v11  ;;  %p873_p4 = pneg %p872_p13  ;;  %p878_p7 = scmp.lt.s32.totalorder %s876_s27, %s870_s20 }
  0x40   : > { %215 = vadd.xlane.f32.xlu0 %v214_v16  ;;  %p879_p8 = por %p878_p7, %p877_p5 }
  0x42   : > { %212 = vadd.xlane.f32.xlu1 %v211_v17  ;;  %p880_p10 = pnand %p879_p8, %p873_p4 }
  0x44   : > { %209 = vadd.xlane.f32.xlu0 %v208_v22 }
  0x46   : > { %206 = vadd.xlane.f32.xlu1 %v205_v23 }
  0xc1   : > { %v228_v25 = vpop.xlane.xlu0 %227 }
  0xc2   : > { %v244_v26 = vmul.f32 0.00390625, %v228_v25 }
  0xc3   : > { %v222_v27 = vpop.xlane.xlu1 %221 }
  0xc4   : > { %723 = vmatpush3.msra.mxu0 %v244_v26  ;;  %v242_v31 = vmul.f32 0.00390625, %v222_v27 }
  0xc5   : > { %v225_v28 = vpop.xlane.xlu0 %224  ;;  %724 = vmatprep.subr.mxu0 %v939_v24 }
  0xc6   : > { %v243_v29 = vmul.f32 0.00390625, %v225_v28 }
  0xc7   : > { %v219_v30 = vpop.xlane.xlu1 %218 }
  0xc8   : > { %725 = vmatpush3.msra.mxu0 %v243_v29  ;;  %v241_v32 = vmul.f32 0.00390625, %v219_v30 }
  0xc9   : > { %726 = vmatprep.subr.mxu0 %v939_v24  ;;  %v216_v33 = vpop.xlane.xlu0 %215 }
  0xca   : > { %727 = vmatpush3.msra.mxu0 %v242_v31  ;;  %v240_v34 = vmul.f32 0.00390625, %v216_v33 }
  0xcb   : > { %v213_v35 = vpop.xlane.xlu1 %212  ;;  %728 = vmatprep.subr.mxu0 %v939_v24 }
  0xcc   : > { %729 = vmatpush3.msra.mxu0 %v241_v32  ;;  %v239_v36 = vmul.f32 0.00390625, %v213_v35 }
  0xcd   : > { %730 = vmatprep.subr.mxu0 %v939_v24  ;;  %v210_v37 = vpop.xlane.xlu0 %209 }
  0xce   : > { %731 = vmatpush3.msra.mxu0 %v240_v34  ;;  %v238_v38 = vmul.f32 0.00390625, %v210_v37 }
  0xcf   : > { %v207_v39 = vpop.xlane.xlu1 %206  ;;  %732 = vmatprep.subr.mxu0 %v939_v24 }
  0xd0   : > { %733 = vmatpush3.msra.mxu0 %v239_v36  ;;  %v237_v40 = vmul.f32 0.00390625, %v207_v39 }
  0xd1   : > { %734 = vmatprep.subr.mxu0 %v939_v24 }
  0xd2   : > { %735 = vmatpush3.msra.mxu0 %v238_v38 }
  0xd3   : > { %736 = vmatprep.subr.mxu0 %v939_v24 }
  0xd4   : > { %737 = vmatpush3.msra.mxu0 %v237_v40 }
  0xd5   : > { %739 = vmatmul.mubr.msk.f32.vlgmr.msra.gmra.mxu0 %vm246_vm1, %v245_v41 }
 0x195   : > { %v316_v43 = vpop.f32.mrf.mxu0 }
 0x196   : > { %v320_v44 = vmax.f32 %v316_v43, 0.0 }
 0x197   : > { %v740_v45 = vpop.f32.mrf.mxu0 }
 0x198   : > { %741 = vmatprep.subr.msk.mxu1 %vm354_vm3, %v320_v44 }
 0x199   : > { %742 = vmatpush3.msk.msra.mxu1 %vm354_vm3, %v320_v44 }
 0x19a   : > { %744 = vmatmul.mubr.msk.f32.vlgmr.msra.gmra.mxu1 %vm329_vm2, %v322_v46 }
 0x19b   : > { %746 = vmatprep.mubr.msk.f32.mxu1 %vm329_vm2, %v323_v47 }
 0x19e   : > { %747 = vmatmul.mubr.msk.f32.gmra.mxu1 %vm329_vm2, %v324_v48 }
 0x19f   : > { %749 = vmatprep.mubr.msk.f32.mxu1 %vm329_vm2, %v325_v49 }
 0x1a2   : > { %750 = vmatmul.mubr.msk.f32.gmra.mxu1 %vm329_vm2, %v326_v50 }
 0x1a3   : > { %752 = vmatprep.mubr.msk.f32.mxu1 %vm329_vm2, %v327_v51 }
 0x1a6   : > { %753 = vmatmul.mubr.msk.f32.gmra.mxu1 %vm329_vm2, %v328_v52 }
 0x25a   : > { %v745_v54 = vpop.f32.mrf.mxu1 }
 0x25b   : > { %v690_v55 = vmul.f32 -1.442695, %v745_v54 }
 0x25c   : > { %v424_v56 = vpop.f32.mrf.mxu1 }
 0x25d   : > { %810 = vpow2.f32 %v690_v55  ;;  %v689_v57 = vmul.f32 -1.442695, %v424_v56 }
 0x25e   : > { %v748_v58 = vpop.f32.mrf.mxu1 }
 0x25f   : > { %812 = vpow2.f32 %v689_v57  ;;  %v692_v59 = vmul.f32 -1.442695, %v748_v58 }
 0x260   : > { %v434_v60 = vpop.f32.mrf.mxu1 }
 0x261   : > { %814 = vpow2.f32 %v692_v59  ;;  %v691_v61 = vmul.f32 -1.442695, %v434_v60 }
 0x262   : > { %v751_v62 = vpop.f32.mrf.mxu1 }
 0x263   : > { %816 = vpow2.f32 %v691_v61  ;;  %v694_v63 = vmul.f32 -1.442695, %v751_v62 }
 0x264   : > { %v444_v3 = vpop.f32.mrf.mxu1 }
 0x265   : > { %818 = vpow2.f32 %v694_v63  ;;  %v693_v7 = vmul.f32 -1.442695, %v444_v3 }
 0x266   : > { %v754_v10 = vpop.f32.mrf.mxu1 }
 0x267   : > { %820 = vpow2.f32 %v693_v7  ;;  %v696_v24 = vmul.f32 -1.442695, %v754_v10 }
 0x268   : > { %v454_v11 = vpop.f32.mrf.mxu1 }
 0x269   : > { %v695_v16 = vmul.f32 -1.442695, %v454_v11 }
 0x26a   : > { %v811_v17 = vpop.eup %810 }
 0x26b   : > { %v488_v22 = vadd.f32 1.0, %v811_v17  ;;  %822 = vpow2.f32 %v695_v16 }
 0x26c   : > { %v813_v23 = vpop.eup %812 }
 0x26d   : > { %824 = vrcp.f32 %v488_v22  ;;  %v487_v25 = vadd.f32 1.0, %v813_v23 }
 0x26e   : > { %v815_v26 = vpop.eup %814 }
 0x26f   : > { %826 = vrcp.f32 %v487_v25  ;;  %v490_v27 = vadd.f32 1.0, %v815_v26 }
 0x270   : > { %v817_v28 = vpop.eup %816  ;;  %828 = vpow2.f32 %v696_v24 }
 0x271   : > { %830 = vrcp.f32 %v490_v27  ;;  %v489_v29 = vadd.f32 1.0, %v817_v28 }
 0x272   : > { %v819_v30 = vpop.eup %818 }
 0x273   : > { %v492_v31 = vadd.f32 1.0, %v819_v30  ;;  %832 = vrcp.f32 %v489_v29 }
 0x274   : > { %v821_v32 = vpop.eup %820 }
 0x275   : > { %834 = vrcp.f32 %v492_v31  ;;  %v491_v34 = vadd.f32 1.0, %v821_v32 }
 0x277   : > { %836 = vrcp.f32 %v491_v34 }
 0x278   : > { %v823_v33 = vpop.eup %822 }
 0x279   : > { %v493_v38 = vadd.f32 1.0, %v823_v33 }
 0x27a   : > { %v825_v35 = vpop.eup %824 }
 0x27b   : > { %518 = vperm.xlu1 %809, %v825_v35   ;;  %838 = vrcp.f32 %v493_v38 }
 0x27c   : > { %v827_v36 = vpop.eup %826 }
 0x27d   : > { %v829_v37 = vpop.eup %828  ;;  %513 = vperm.xlu0 %808, %v827_v36  }
 0x27e   : > { %v831_v39 = vpop.eup %830  ;;  %v494_v40 = vadd.f32 1.0, %v829_v37 }
 0x27f   : > { %528 = vperm.xlu1 %809, %v831_v39  }
 0x280   : > { %v833_v41 = vpop.eup %832  ;;  %840 = vrcp.f32 %v494_v40 }
 0x282   : > { %v835_v42 = vpop.eup %834 }
 0x283   : > { %523 = vperm.xlu1 %809, %v833_v41  }
 0x284   : > { %v837_v43 = vpop.eup %836 }
 0x287   : > { %538 = vperm.xlu1 %809, %v835_v42  }
 0x288   : > { %v839_v44 = vpop.eup %838 }
 0x28b   : > { %533 = vperm.xlu1 %809, %v837_v43  }
 0x28d   : > { %v841_v45 = vpop.eup %840 }
 0x28f   : > { %543 = vperm.xlu1 %809, %v839_v44  }
 0x293   : > { %548 = vperm.xlu1 %809, %v841_v45  }
 0x2f6   : > { %v519_v46 = vpop.permute.xlu1 %518 }
 0x2f7   : > { %v553_v47 = vmul.f32 %v519_v46, %v1108_v18  ;;  %v554_v48 = vmul.f32 %v519_v46, %v1110_v19 }
 0x2f8   : > { %v514_v49 = vpop.permute.xlu0 %513 }
 0x2f9   : > { %569 = vst [vmem:[%s1159_s6 + $0x10] sm:$0xff] %v553_v47  ;;  %570 = vst [vmem:[%s1159_s6 + $0x18] sm:$0xff] %v554_v48  ;;  %v551_v50 = vmul.f32 %v514_v49, %v1112_v20  ;;  %v552_v18 = vmul.f32 %v514_v49, %v1114_v21 }
 0x2fa   : > { %v529_v19 = vpop.permute.xlu1 %528 }
 0x2fb   : > { %567 = vst [vmem:[%s1159_s6] sm:$0xff] %v551_v50  ;;  %568 = vst [vmem:[%s1159_s6 + $0x8] sm:$0xff] %v552_v18  ;;  %v557_v51 = vmul.f32 %v529_v19, %v1096_v12  ;;  %v558_v52 = vmul.f32 %v529_v19, %v1098_v13 }
 0x2fd   : > { %573 = vst [vmem:[%s1159_s6 + $0x30] sm:$0xff] %v557_v51  ;;  %574 = vst [vmem:[%s1159_s6 + $0x38] sm:$0xff] %v558_v52 }
 0x2fe   : > { %v524_v53 = vpop.permute.xlu1 %523 }
 0x2ff   : > { %v555_v54 = vmul.f32 %v524_v53, %v1100_v14  ;;  %v556_v20 = vmul.f32 %v524_v53, %v1102_v15 }
 0x301   : > { %571 = vst [vmem:[%s1159_s6 + $0x20] sm:$0xff] %v555_v54  ;;  %572 = vst [vmem:[%s1159_s6 + $0x28] sm:$0xff] %v556_v20 }
 0x302   : > { %v539_v21 = vpop.permute.xlu1 %538 }
 0x303   : > { %v561_v12 = vmul.f32 %v539_v21, %v1082_v5  ;;  %v562_v13 = vmul.f32 %v539_v21, %v1084_v6 }
 0x305   : > { %577 = vst [vmem:[%s1159_s6 + $0x50] sm:$0xff] %v561_v12  ;;  %578 = vst [vmem:[%s1159_s6 + $0x58] sm:$0xff] %v562_v13 }
 0x306   : > { %v534_v55 = vpop.permute.xlu1 %533 }
 0x307   : > { %v559_v56 = vmul.f32 %v534_v55, %v1088_v8  ;;  %v560_v14 = vmul.f32 %v534_v55, %v1090_v9 }
 0x309   : > { %575 = vst [vmem:[%s1159_s6 + $0x40] sm:$0xff] %v559_v56  ;;  %576 = vst [vmem:[%s1159_s6 + $0x48] sm:$0xff] %v560_v14 }
 0x30a   : > { %v544_v15 = vpop.permute.xlu1 %543 }
 0x30b   : > { %v563_v57 = vmul.f32 %v544_v15, %v1076_v2  ;;  %v564_v5 = vmul.f32 %v544_v15, %v1080_v4 }
 0x30d   : > { %579 = vst [vmem:[%s1159_s6 + $0x60] sm:$0xff] %v563_v57  ;;  %580 = vst [vmem:[%s1159_s6 + $0x68] sm:$0xff] %v564_v5 }
 0x30e   : > { %v549_v6 = vpop.permute.xlu1 %548 }
 0x30f   : > { %v565_v2 = vmul.f32 %v549_v6, %v1072_v0  ;;  %v566_v8 = vmul.f32 %v549_v6, %v1074_v1 }
 0x311   : > { %581 = vst [vmem:[%s1159_s6 + $0x70] sm:$0xff] %v565_v2  ;;  %582 = vst [vmem:[%s1159_s6 + $0x78] sm:$0xff] %v566_v8 }
 0x312   : > { %883 = shalt.err (!%p880_p10)
}
 0x313   : > { %s884_s28 = scalar_lea.hbm %s1192_s19, 2048  ;;  %s888_s10 = scalar_lea.hbm %s1244_s3, 4096 }
 0x314   : > { %p885_p0 = scmp.ne.s32.totalorder %s1192_s19, %s884_s28  ;;  %p889_p1 = scmp.lt.s32.totalorder %s1192_s19, %s1244_s3 }
 0x315   : > { %p890_p3 = scmp.lt.s32.totalorder %s888_s10, %s884_s28 }
 0x316   : > { %p886_p2 = pnand %p885_p0, %p1253_p12 }
 0x317   : > { %p891_p6 = por %p890_p3, %p889_p1 }
 0x318   : > { %p887_p9 = pneg %p886_p2 }
 0x31a   : > { %p892_p11 = pnand %p891_p6, %p887_p9 }
 0x31c   : > { %895 = shalt.err (!%p892_p11)
}
 0x31d   : > { %s943_s4 = smov 256   ;;  %s944_s6 = smov 16  }
 0x31e   : > { %757 = dma.vmem_to_hbm [thread:$0]  (%p1253_p12), %s1194_s7, 2048, %s1192_s19, %s584_s16, %s943_s4, %s943_s4, %s944_s6  }
 0x31f PF: > { %s612_s9 = sand.u32 1, %s922_s12   ;;  %p1254_p13 = scmp.ne.s32.totalorder %s1250_s25, 0 }
 0x320   : > { %p1255_p4 = scmp.ge.s32.totalorder %s934_s15, 2  ;;  %s613_s8 = scalar_lea.sflag [#allocation4], %s612_s9 }
 0x322   : > { %p764_p5 = pnand %p1255_p4, %p1254_p13 }
 0x324   : > { %p765_p7 = pneg %p764_p5 }
 0x326   : > { %917 = dma.done.wait (%p765_p7), %s613_s8, 2048  }
 0x327   : > { %919 = vsyncadd (%p765_p7), %s613_s8, 4294965248  ;;  %p16_p8 = scmp.ge.s32.totalorder %s990_s18, 4   ;;  %s1256_s12 = smov %s926_s13 }
 0x328   : > { %s1257_s13 = smov %s930_s14  ;;  %s1258_s14 = smov %s1002_s21 }
 0x329   : > { %s1259_s15 = smov %s990_s18  ;;  %18 = sbr.rel (!%p16_p8) target bundleno = 5 (0x5), region = 77 }
 0x32e   :  { %618 = vsyncpa [#allocation3], 1 }
 0x32f   :  { %620 = vsyncpa [#allocation3 + $0x1], 1 }
 0x330   :  { %621 = vsyncpa [#allocation4], 1 }
 0x331   :  { %623 = vsyncpa [#allocation4 + $0x1], 1 }

</bundles_post_ra>
